<compile_context>
chip_gen: v6e
topology: v6e:2x2x1
jax: 0.10.0
libtpu: 0.0.40
codegen_flags: <defaults>
</compile_context>

<pallas_src>
import functools

import jax
import jax.numpy as jnp
from jax.experimental import pallas as pl
from jax.experimental.pallas import tpu as pltpu

_VMEM = pl.BlockSpec(memory_space=pltpu.MemorySpace.VMEM)
_VMEM_LIMIT = 32 * 1024 * 1024  # explicit (v5e default is only 16 MiB)


# ----------------------------- conv stack kernel -----------------------------

def _conv_stack_kernel(x_ref, w1_ref, s1_ref, t1_ref, w2_ref, s2_ref, t2_ref, o_ref,
                       *, B):
    # x_ref : (L*B, Cin) f32  time-major flat input
    # w*_ref: (5*Cin_l, 64) bf16 im2col-reshaped conv weights (tap-major rows)
    # s*/t* : (1, 64) f32 folded BatchNorm scale / shift (conv bias included)
    # o_ref : (L*B, 64) bf16 time-major flat output
    x = x_ref[...]
    n = x.shape[0]

    def im2col(h):
        # Shift by whole timesteps (= B rows in time-major flat layout); the zero pad
        # at both ends supplies the k=5 / padding=2 boundary zeros for every sequence.
        C = h.shape[1]
        z = jnp.zeros((2 * B, C), h.dtype)
        hp = jnp.concatenate([z, h, z], axis=0)                    # (n + 4B, C)
        cols = [hp[dk * B: dk * B + n, :] for dk in range(5)]      # tap dk -> x[t+dk-2]
        return jnp.concatenate(cols, axis=1).astype(jnp.bfloat16)  # (n, 5*C)

    h1 = jnp.dot(im2col(x), w1_ref[...], preferred_element_type=jnp.float32)
    h1 = jnp.maximum(h1 * s1_ref[...] + t1_ref[...], 0.0)          # conv1 + BN1 + ReLU
    h2 = jnp.dot(im2col(h1), w2_ref[...], preferred_element_type=jnp.float32)
    h2 = jnp.maximum(h2 * s2_ref[...] + t2_ref[...], 0.0)          # conv2 + BN2 + ReLU
    o_ref[...] = h2.astype(o_ref.dtype)
    # TODO(synk): train-mode BatchNorm (batch statistics) is not implemented; eval
    # running-stats semantics are folded into scale/shift.


# ------------------------------- bi-LSTM kernel -------------------------------

def _bilstm_kernel(x_ref, wih_ref, b_ref, whh_ref, o_ref, *, L, B, H):
    # x_ref  : (L*B, D)  bf16/f32 time-major flat layer input
    # wih_ref: (D, 8H)   bf16, columns gate-major, direction-minor:
    #                    [i_f, i_b, f_f, f_b, g_f, g_b, o_f, o_b]
    # b_ref  : (1, 8H)   f32, b_ih + b_hh, same column order
    # whh_ref: (2H, 8H)  bf16 block-diagonal recurrent weights (rows = [h_fwd | h_bwd])
    # o_ref  : (L*B, 2H) bf16 time-major flat output ([:, :H] forward, [:, H:] backward)
    x = x_ref[...].astype(jnp.bfloat16)

    # 1) input projection for every timestep and BOTH directions: one MXU matmul.
    xp = jnp.dot(x, wih_ref[...], preferred_element_type=jnp.float32) + b_ref[...]
    whh = whh_ref[...]                                             # (2H, 8H) bf16

    lane = jax.lax.broadcasted_iota(jnp.int32, (1, 8 * H), 1)
    fwd_cols = ((lane // H) % 2) == 0            # forward-direction gate columns
    g_cols = (lane >= 4 * H) & (lane < 6 * H)    # "g" gate columns (both directions)

    h = jnp.zeros((B, 2 * H), jnp.float32)
    c = jnp.zeros((B, 2 * H), jnp.float32)
    out_f = [None] * L
    out_b = [None] * L

    # 2) fused forward + backward recurrence (PyTorch gate order i, f, g, o), statically
    #    unrolled: all per-step slices are static, no dynamic sublane slices, no output
    #    read-modify-write.  (For long sequences switch to pl.loop + a (L, B, 8H) VMEM
    #    scratch indexed on the first axis.)
    for s in range(L):
        t, tb = s, L - 1 - s
        xf = xp[t * B:(t + 1) * B, :]            # projection of x[t]       (forward)
        xb = xp[tb * B:(tb + 1) * B, :]          # projection of x[L-1-s]   (backward)
        gates = jnp.where(fwd_cols, xf, xb) + jnp.dot(
            h.astype(jnp.bfloat16), whh, preferred_element_type=jnp.float32)   # (B, 8H)
        act = jnp.where(g_cols, jnp.tanh(gates), jax.nn.sigmoid(gates))
        i_g = act[:, 0:2 * H]
        f_g = act[:, 2 * H:4 * H]
        g_g = act[:, 4 * H:6 * H]
        o_g = act[:, 6 * H:8 * H]
        c = f_g * c + i_g * g_g                                    # (B, 2H)
        h = o_g * jnp.tanh(c)
        out_f[t] = h[:, :H]                      # forward half  -> time t
        out_b[tb] = h[:, H:]                     # backward half -> time L-1-s

    o = jnp.concatenate([jnp.concatenate(out_f, axis=0),
                         jnp.concatenate(out_b, axis=0)], axis=1)  # (L*B, 2H)
    o_ref[...] = o.astype(o_ref.dtype)
    # TODO(synk): inter-layer LSTM dropout is train-mode only; identity in eval.


# --------------------------- attention + fc kernel ---------------------------

def _attn_fc_kernel(lo_ref, w1t_ref, b1_ref, w2_ref, b2_ref, wfct_ref, bfc_ref, o_ref,
                    *, L, B):
    # lo_ref: (L*B, 2H) bf16 time-major flat bi-LSTM output
    # o_ref : (B, 3) f32 logits
    lo = lo_ref[...]
    hid = jnp.tanh(jnp.dot(lo, w1t_ref[...],
                           preferred_element_type=jnp.float32) + b1_ref[...])   # (L*B, H)
    scores = jnp.sum(hid * w2_ref[...], axis=1, keepdims=True) + b2_ref[...]    # (L*B, 1)
    lof = lo.astype(jnp.float32)

    # per-sequence softmax over time + attention-weighted sum.  Time t of sequence b
    # lives at row t*B + b; L is small and static so the loops unroll.
    m = scores[0:B, :]
    for t in range(1, L):
        m = jnp.maximum(m, scores[t * B:(t + 1) * B, :])
    den = jnp.zeros((B, 1), jnp.float32)
    ctx = jnp.zeros((B, lof.shape[1]), jnp.float32)
    for t in range(L):
        e = jnp.exp(scores[t * B:(t + 1) * B, :] - m)              # (B, 1)
        den = den + e
        ctx = ctx + e * lof[t * B:(t + 1) * B, :]
    ctx = ctx / den                                                # (B, 2H)

    # TODO(synk): self.dropout(context) is train-mode only; identity in eval.
    o_ref[...] = (jnp.dot(ctx.astype(jnp.bfloat16), wfct_ref[...],
                          preferred_element_type=jnp.float32) + bfc_ref[...])   # (B, 3)


# ------------------------------ parameter plumbing ------------------------------

def init_params(key, input_channels=20, hidden_size=32, num_layers=2):
    def nrm(k, shape, scale=0.1):
        return scale * jax.random.normal(k, shape, dtype=jnp.float32)

    keys = iter(jax.random.split(key, 64))
    H = hidden_size
    p = {}
    p['conv1_w'] = nrm(next(keys), (64, input_channels, 5))
    p['conv1_b'] = nrm(next(keys), (64,))
    p['bn1_gamma'] = 1.0 + nrm(next(keys), (64,))
    p['bn1_beta'] = nrm(next(keys), (64,))
    p['bn1_mean'] = jnp.zeros((64,), jnp.float32)
    p['bn1_var'] = jnp.ones((64,), jnp.float32)
    p['conv2_w'] = nrm(next(keys), (64, 64, 5))
    p['conv2_b'] = nrm(next(keys), (64,))
    p['bn2_gamma'] = 1.0 + nrm(next(keys), (64,))
    p['bn2_beta'] = nrm(next(keys), (64,))
    p['bn2_mean'] = jnp.zeros((64,), jnp.float32)
    p['bn2_var'] = jnp.ones((64,), jnp.float32)
    p['lstm'] = []
    for layer in range(num_layers):
        in_sz = 64 if layer == 0 else 2 * H
        dirs = []
        for _ in range(2):  # forward, backward
            dirs.append({
                'w_ih': nrm(next(keys), (4 * H, in_sz)),
                'w_hh': nrm(next(keys), (4 * H, H)),
                'b_ih': nrm(next(keys), (4 * H,)),
                'b_hh': nrm(next(keys), (4 * H,)),
            })
        p['lstm'].append(dirs)
    p['att_w1'] = nrm(next(keys), (H, 2 * H))
    p['att_b1'] = nrm(next(keys), (H,))
    p['att_w2'] = nrm(next(keys), (1, H))
    p['att_b2'] = nrm(next(keys), (1,))
    p['fc_w'] = nrm(next(keys), (3, 2 * H))
    p['fc_b'] = nrm(next(keys), (3,))
    return p


def prepare_params(p, hidden_size=32, bn_eps=1e-5):
    """Fold BatchNorm, reshape conv weights for single-matmul im2col, re-block the LSTM
    weights (gate-major / block-diagonal) and pre-cast every matmul operand to bf16 —
    all once, off the hot path."""
    H = hidden_size
    q = {}
    cin = p['conv1_w'].shape[1]
    # (Cout, Cin, K) -> (K, Cin, Cout) -> (K*Cin, Cout): rows ordered tap-major.
    q['conv1_w'] = jnp.transpose(p['conv1_w'], (2, 1, 0)).reshape(5 * cin, 64).astype(jnp.bfloat16)
    q['conv2_w'] = jnp.transpose(p['conv2_w'], (2, 1, 0)).reshape(5 * 64, 64).astype(jnp.bfloat16)
    s1 = p['bn1_gamma'] / jnp.sqrt(p['bn1_var'] + bn_eps)
    q['scale1'] = s1.reshape(1, -1)
    q['shift1'] = (p['bn1_beta'] - p['bn1_mean'] * s1 + p['conv1_b'] * s1).reshape(1, -1)
    s2 = p['bn2_gamma'] / jnp.sqrt(p['bn2_var'] + bn_eps)
    q['scale2'] = s2.reshape(1, -1)
    q['shift2'] = (p['bn2_beta'] - p['bn2_mean'] * s2 + p['conv2_b'] * s2).reshape(1, -1)

    q['lstm'] = []
    z = jnp.zeros((H, H), jnp.float32)
    for dirs in p['lstm']:
        wf, wb = dirs
        bf = wf['b_ih'] + wf['b_hh']
        bb = wb['b_ih'] + wb['b_hh']
        whh_f_t = wf['w_hh'].T                                     # (H, 4H)
        whh_b_t = wb['w_hh'].T
        wih_cols, b_cols, whh_cols = [], [], []
        for g in range(4):                                         # gate-major, dir-minor
            sl = slice(g * H, (g + 1) * H)
            wih_cols += [wf['w_ih'][sl, :].T, wb['w_ih'][sl, :].T]
            b_cols += [bf[sl], bb[sl]]
            whh_cols += [jnp.concatenate([whh_f_t[:, sl], z], axis=0),
                         jnp.concatenate([z, whh_b_t[:, sl]], axis=0)]
        wih = jnp.concatenate(wih_cols, axis=1).astype(jnp.bfloat16)   # (D, 8H)
        bias = jnp.concatenate(b_cols).reshape(1, 8 * H)               # (1, 8H) f32
        whh = jnp.concatenate(whh_cols, axis=1).astype(jnp.bfloat16)   # (2H, 8H)
        q['lstm'].append((wih, bias, whh))

    q['att_w1t'] = p['att_w1'].T.astype(jnp.bfloat16)              # (2H, H)
    q['att_b1'] = p['att_b1'].reshape(1, H)
    q['att_w2'] = p['att_w2'].reshape(1, H)
    q['att_b2'] = p['att_b2'].reshape(1, 1)
    q['fc_wt'] = p['fc_w'].T.astype(jnp.bfloat16)                  # (2H, 3)
    q['fc_b'] = p['fc_b'].reshape(1, 3)
    return q


# ----------------------------------- forward -----------------------------------

def forward(x, q, hidden_size=32, num_layers=2):
    # x: (B, L, Cin) float32  ->  (B, 3) float32 logits
    B, L, Cin = x.shape
    H = hidden_size
    n = B * L
    cparams = pltpu.CompilerParams(vmem_limit_bytes=_VMEM_LIMIT)

    # One tiny transpose of the raw input establishes the time-major flat layout used by
    # every kernel (replaces the two large activation transposes of the previous version).
    x_tm = jnp.transpose(x, (1, 0, 2)).reshape(n, Cin)

    # fused conv1+BN1+ReLU -> conv2+BN2+ReLU for the whole batch in one invocation
    h = pl.pallas_call(
        functools.partial(_conv_stack_kernel, B=B),
        out_shape=jax.ShapeDtypeStruct((n, 64), jnp.bfloat16),
        in_specs=[_VMEM] * 7,
        out_specs=_VMEM,
        compiler_params=cparams,
    )(x_tm, q['conv1_w'], q['scale1'], q['shift1'],
      q['conv2_w'], q['scale2'], q['shift2'])

    # bidirectional multi-layer LSTM, one fused kernel per layer (time-major flat)
    for layer in range(num_layers):
        wih, bias, whh = q['lstm'][layer]
        h = pl.pallas_call(
            functools.partial(_bilstm_kernel, L=L, B=B, H=H),
            out_shape=jax.ShapeDtypeStruct((n, 2 * H), jnp.bfloat16),
            in_specs=[_VMEM] * 4,
            out_specs=_VMEM,
            compiler_params=cparams,
        )(h, wih, bias, whh)

    # attention + softmax over sequence + weighted sum + final fc, whole batch at once
    out = pl.pallas_call(
        functools.partial(_attn_fc_kernel, L=L, B=B),
        out_shape=jax.ShapeDtypeStruct((B, 3), jnp.float32),
        in_specs=[_VMEM] * 7,
        out_specs=_VMEM,
        compiler_params=cparams,
    )(h, q['att_w1t'], q['att_b1'], q['att_w2'], q['att_b2'], q['fc_wt'], q['fc_b'])
    return out


if __name__ == "__main__":
    key = jax.random.PRNGKey(0)
    kx, kp = jax.random.split(key)
    B, L, Cin, H = 2, 8, 20, 32
    x = jax.random.normal(kx, (B, L, Cin), dtype=jnp.float32)
    params = init_params(kp, input_channels=Cin, hidden_size=H, num_layers=2)
    prepped = prepare_params(params, hidden_size=H)

    out = forward(x, prepped, hidden_size=H, num_layers=2)
    out = jax.block_until_ready(out)

    assert out.shape == (B, 3), out.shape
    assert bool(jnp.all(jnp.isfinite(out)))
    print("KERNEL_OK")
</pallas_src>

<mosaic_0001>
module attributes {stable_mosaic.version = 11 : i64} {
  func.func @_conv_stack_kernel(%arg0: memref<16x20xf32, #tpu.memory_space<vmem>>, %arg1: memref<100x64xbf16, #tpu.memory_space<vmem>>, %arg2: memref<1x64xf32, #tpu.memory_space<vmem>>, %arg3: memref<1x64xf32, #tpu.memory_space<vmem>>, %arg4: memref<320x64xbf16, #tpu.memory_space<vmem>>, %arg5: memref<1x64xf32, #tpu.memory_space<vmem>>, %arg6: memref<1x64xf32, #tpu.memory_space<vmem>>, %arg7: memref<16x64xbf16, #tpu.memory_space<vmem>>) attributes {dimension_semantics = [], scalar_prefetch = 0 : i64, scratch_operands = 0 : i64, tpu.core_type = #tpu.core_type<tc>} {
    %c0 = arith.constant 0 : index
    %c0_0 = arith.constant 0 : index
    %0 = vector.load %arg0[%c0, %c0_0] : memref<16x20xf32, #tpu.memory_space<vmem>>, vector<16x20xf32>
    %cst = arith.constant 0.000000e+00 : f32
    %1 = vector.broadcast %cst : f32 to vector<4x20xf32>
    %2 = tpu.concatenate %1, %0, %1 in 0 : vector<4x20xf32>, vector<16x20xf32>, vector<4x20xf32> -> vector<24x20xf32>
    %3 = vector.extract_strided_slice %2 {offsets = [0, 0], sizes = [16, 20], strides = [1, 1]} : vector<24x20xf32> to vector<16x20xf32>
    %4 = vector.extract_strided_slice %2 {offsets = [2, 0], sizes = [16, 20], strides = [1, 1]} : vector<24x20xf32> to vector<16x20xf32>
    %5 = vector.extract_strided_slice %2 {offsets = [4, 0], sizes = [16, 20], strides = [1, 1]} : vector<24x20xf32> to vector<16x20xf32>
    %6 = vector.extract_strided_slice %2 {offsets = [6, 0], sizes = [16, 20], strides = [1, 1]} : vector<24x20xf32> to vector<16x20xf32>
    %7 = vector.extract_strided_slice %2 {offsets = [8, 0], sizes = [16, 20], strides = [1, 1]} : vector<24x20xf32> to vector<16x20xf32>
    %8 = tpu.concatenate %3, %4, %5, %6, %7 in 1 : vector<16x20xf32>, vector<16x20xf32>, vector<16x20xf32>, vector<16x20xf32>, vector<16x20xf32> -> vector<16x100xf32>
    %9 = arith.truncf %8 : vector<16x100xf32> to vector<16x100xbf16>
    %c0_1 = arith.constant 0 : index
    %c0_2 = arith.constant 0 : index
    %10 = vector.load %arg1[%c0_1, %c0_2] : memref<100x64xbf16, #tpu.memory_space<vmem>>, vector<100x64xbf16>
    %cst_3 = arith.constant dense<0.000000e+00> : vector<16x64xf32>
    %11 = tpu.matmul %9, %10, %cst_3 {dimension_numbers = #tpu.dot_dimension_numbers<[1], [0], [0], [1], [0, 0, 1, 1], [], []>} : vector<16x100xbf16>, vector<100x64xbf16>, vector<16x64xf32> -> vector<16x64xf32>
    %c0_4 = arith.constant 0 : index
    %c0_5 = arith.constant 0 : index
    %12 = vector.load %arg2[%c0_4, %c0_5] : memref<1x64xf32, #tpu.memory_space<vmem>>, vector<1x64xf32>
    %13 = vector.broadcast %12 : vector<1x64xf32> to vector<16x64xf32>
    %14 = arith.mulf %11, %13 : vector<16x64xf32>
    %c0_6 = arith.constant 0 : index
    %c0_7 = arith.constant 0 : index
    %15 = vector.load %arg3[%c0_6, %c0_7] : memref<1x64xf32, #tpu.memory_space<vmem>>, vector<1x64xf32>
    %16 = vector.broadcast %15 : vector<1x64xf32> to vector<16x64xf32>
    %17 = arith.addf %14, %16 : vector<16x64xf32>
    %cst_8 = arith.constant 0.000000e+00 : f32
    %18 = vector.broadcast %cst_8 : f32 to vector<16x64xf32>
    %19 = arith.maximumf %17, %18 : vector<16x64xf32>
    %cst_9 = arith.constant 0.000000e+00 : f32
    %20 = vector.broadcast %cst_9 : f32 to vector<4x64xf32>
    %21 = tpu.concatenate %20, %19, %20 in 0 : vector<4x64xf32>, vector<16x64xf32>, vector<4x64xf32> -> vector<24x64xf32>
    %22 = vector.extract_strided_slice %21 {offsets = [0, 0], sizes = [16, 64], strides = [1, 1]} : vector<24x64xf32> to vector<16x64xf32>
    %23 = vector.extract_strided_slice %21 {offsets = [2, 0], sizes = [16, 64], strides = [1, 1]} : vector<24x64xf32> to vector<16x64xf32>
    %24 = vector.extract_strided_slice %21 {offsets = [4, 0], sizes = [16, 64], strides = [1, 1]} : vector<24x64xf32> to vector<16x64xf32>
    %25 = vector.extract_strided_slice %21 {offsets = [6, 0], sizes = [16, 64], strides = [1, 1]} : vector<24x64xf32> to vector<16x64xf32>
    %26 = vector.extract_strided_slice %21 {offsets = [8, 0], sizes = [16, 64], strides = [1, 1]} : vector<24x64xf32> to vector<16x64xf32>
    %27 = tpu.concatenate %22, %23, %24, %25, %26 in 1 : vector<16x64xf32>, vector<16x64xf32>, vector<16x64xf32>, vector<16x64xf32>, vector<16x64xf32> -> vector<16x320xf32>
    %28 = arith.truncf %27 : vector<16x320xf32> to vector<16x320xbf16>
    %c0_10 = arith.constant 0 : index
    %c0_11 = arith.constant 0 : index
    %29 = vector.load %arg4[%c0_10, %c0_11] : memref<320x64xbf16, #tpu.memory_space<vmem>>, vector<320x64xbf16>
    %cst_12 = arith.constant dense<0.000000e+00> : vector<16x64xf32>
    %30 = tpu.matmul %28, %29, %cst_12 {dimension_numbers = #tpu.dot_dimension_numbers<[1], [0], [0], [1], [0, 0, 1, 1], [], []>} : vector<16x320xbf16>, vector<320x64xbf16>, vector<16x64xf32> -> vector<16x64xf32>
    %c0_13 = arith.constant 0 : index
    %c0_14 = arith.constant 0 : index
    %31 = vector.load %arg5[%c0_13, %c0_14] : memref<1x64xf32, #tpu.memory_space<vmem>>, vector<1x64xf32>
    %32 = vector.broadcast %31 : vector<1x64xf32> to vector<16x64xf32>
    %33 = arith.mulf %30, %32 : vector<16x64xf32>
    %c0_15 = arith.constant 0 : index
    %c0_16 = arith.constant 0 : index
    %34 = vector.load %arg6[%c0_15, %c0_16] : memref<1x64xf32, #tpu.memory_space<vmem>>, vector<1x64xf32>
    %35 = vector.broadcast %34 : vector<1x64xf32> to vector<16x64xf32>
    %36 = arith.addf %33, %35 : vector<16x64xf32>
    %cst_17 = arith.constant 0.000000e+00 : f32
    %37 = vector.broadcast %cst_17 : f32 to vector<16x64xf32>
    %38 = arith.maximumf %36, %37 : vector<16x64xf32>
    %39 = arith.truncf %38 : vector<16x64xf32> to vector<16x64xbf16>
    %c0_18 = arith.constant 0 : index
    %c0_19 = arith.constant 0 : index
    %40 = vector.load %arg7[%c0_18, %c0_19] : memref<16x64xbf16, #tpu.memory_space<vmem>>, vector<16x64xbf16>
    tpu.vector_store %arg7[%c0_18, %c0_19], %39 {strides = array<i32>} : memref<16x64xbf16, #tpu.memory_space<vmem>>, vector<16x64xbf16>,
    return
  }
}

</mosaic_0001>

<bundles_post_ra>
// kernel: tpu_custom_call.1
= control target key start
LH: loop header
LB: loop body
LE: loop exit
PB: predicated region body
PF: predicated region fallthrough
CT: control target
= control target key end

     0   :  { %vm32_vm0 = vcmask 1043456   ;;  %vm43_vm1 = vcmask 1045504   ;;  %vm66_vm2 = vcmask 1041408   ;;  %v748_v4 = vmov 0.0   ;;  %s750_s9 = smov 60   ;;  %s752_s12 = smov 40   ;;  %s955_s0 = inlined_call_operand.vmem [shape: f32[16,20], index: 0, kind: input, shape index: {}]   ;;  %s956_s1 = inlined_call_operand.vmem [shape: bf16[100,64], index: 1, kind: input, shape index: {}]   ;;  %s957_s2 = inlined_call_operand.vmem [shape: f32[1,64], index: 2, kind: input, shape index: {}]   ;;  %s958_s3 = inlined_call_operand.vmem [shape: f32[1,64], index: 3, kind: input, shape index: {}]   ;;  %s959_s4 = inlined_call_operand.vmem [shape: bf16[320,64], index: 4, kind: input, shape index: {}]   ;;  %s960_s5 = inlined_call_operand.vmem [shape: f32[1,64], index: 5, kind: input, shape index: {}]   ;;  %s961_s6 = inlined_call_operand.vmem [shape: f32[1,64], index: 6, kind: input, shape index: {}]   ;;  %s962_s7 = inlined_call_operand.hbm [shape: bf16[16,64], index: 7, kind: output, shape index: {}]  }
   0x1   :  { %v28_v0 = vld [vmem:[%s955_s0] sm:$0xff]  ;;  %v29_v1 = vld [vmem:[%s955_s0 + $0x8] sm:$0xff]  ;;  %630 = vmatprep.subr.bf16.mxu0 %v748_v4  ;;  %v699_v5 = vld [vmem:[%s956_s1 + $0x30] ss:$0 sps:$4 sm:$0x33]   ;;  %s749_s0 = smov 20  }
   0x2   :  { %v33_v2 = vrot.slane %v28_v0, 4  ;;  %v34_v3 = vrot.slane %v29_v1, 4  ;;  %v154_v26 = vsel %vm66_vm2, %v699_v5, 0  ;;  %v700_v28 = vld [vmem:[%s956_s1 + $0x28] sm:$0xff]   ;;  %v701_v30 = vld [vmem:[%s956_s1 + $0x20] sm:$0xff]   ;;  %vm751_vm3 = vmmov 0  }
   0x3   :  { %631 = vmatpush3.bf16.msra.mxu0 %v154_v26  ;;  %644 = vmatprep.mubr.msk.bf16.mxu0 %vm751_vm3, %v748_v4  ;;  %s753_s13 = smov 80   ;;  %v702_v31 = vld [vmem:[%s956_s1 + $0x18] sm:$0xff]   ;;  %v703_v32 = vld [vmem:[%s956_s1 + $0x10] sm:$0xff]  }
   0x4   :  { %v808_v6 = vsel %vm32_vm0, %v33_v2, %v34_v3  ;;  %v811_v7 = vsel %vm32_vm0, 0.0, %v33_v2  ;;  %v40_v8 = vsel %vm32_vm0, %v34_v3, 0.0  ;;  %632 = vmatprep.subr.bf16.mxu0 %v748_v4 }
   0x5   :  { %v44_v9 = vrot.slane %v811_v7, 2  ;;  %v45_v10 = vrot.slane %v808_v6, 2  ;;  %v47_v11 = vrot.slane %v40_v8, 2  ;;  %v67_v12 = vrot.slane %v811_v7, 6 }
   0x6   :  { %v68_v13 = vrot.slane %v808_v6, 6  ;;  %v70_v14 = vrot.slane %v40_v8, 6  ;;  %v55_v15 = vrot.slane %v811_v7, 4  ;;  %v56_v16 = vrot.slane %v808_v6, 4 }
   0x7   :  { %v46_v17 = vsel %vm43_vm1, %v44_v9, %v45_v10  ;;  %v48_v18 = vsel %vm43_vm1, %v45_v10, %v47_v11  ;;  %v58_v19 = vrot.slane %v40_v8, 4  ;;  %v684_v29 = vpack.i.bf16 %v40_v8, %v808_v6  ;;  %633 = vmatpush3.bf16.msra.mxu0 %v700_v28 }
   0x8   :  { %v669_v20 = vpack.i.bf16 %v48_v18, %v46_v17  ;;  %v69_v21 = vsel %vm66_vm2, %v67_v12, %v68_v13  ;;  %v71_v22 = vsel %vm66_vm2, %v68_v13, %v70_v14  ;;  %v57_v23 = vsel %vm32_vm0, %v55_v15, %v56_v16  ;;  %634 = vmatprep.subr.bf16.mxu0 %v748_v4 }
   0x9   :  { %v679_v24 = vpack.i.bf16 %v71_v22, %v69_v21  ;;  %v59_v25 = vsel %vm32_vm0, %v56_v16, %v58_v19 }
   0xa   :  { %670 = vrot.lane.b32.xlu0 %v669_v20, %s749_s0  ;;  %v674_v27 = vpack.i.bf16 %v59_v25, %v57_v23 }
   0xb   :  { %680 = vrot.lane.b32.xlu1 %v679_v24, %s750_s9  ;;  %635 = vmatpush3.bf16.msra.mxu0 %v701_v30 }
   0xc   :  { %636 = vmatprep.subr.bf16.mxu0 %v748_v4 }
   0xe   :  { %675 = vrot.lane.b32.xlu0 %v674_v27, %s752_s12 }
   0xf   :  { %685 = vrot.lane.b32.xlu1 %v684_v29, %s753_s13  ;;  %637 = vmatpush3.bf16.msra.mxu0 %v702_v31 }
  0x10   :  { %638 = vmatprep.subr.bf16.mxu0 %v748_v4 }
  0x11   :  { %12 = vsyncpa [#allocation3], 0  ;;  %v704_v33 = vld [vmem:[%s956_s1 + $0x8] sm:$0xff]   ;;  %v705_v34 = vld [vmem:[%s956_s1] sm:$0xff]   ;;  %vm84_vm4 = vcmask 162816   ;;  %vm87_vm5 = vcmask 326656  }
  0x12   :  { %vm90_vm6 = vcmask 490496   ;;  %vm93_vm7 = vcmask 654336   ;;  %vm149_vm8 = vcmask 818176   ;;  %v706_v56 = vld [vmem:[%s959_s4 + $0x98] sm:$0xff]   ;;  %v707_v57 = vld [vmem:[%s959_s4 + $0x90] sm:$0xff]   ;;  %v708_v58 = vld [vmem:[%s959_s4 + $0x88] sm:$0xff]  }
  0x13   :  { %639 = vmatpush3.bf16.msra.mxu0 %v703_v32  ;;  %v709_v59 = vld [vmem:[%s959_s4 + $0x80] sm:$0xff]   ;;  %v710_v60 = vld [vmem:[%s959_s4 + $0x78] sm:$0xff]   ;;  %v712_v62 = vld [vmem:[%s959_s4 + $0x70] sm:$0xff]   ;;  %vm258_vm9 = vcmask 523264   ;;  %vm539_vm10 = vcmask 519168   ;;  %s755_s18 = smov [#allocation2]  }
  0x14   :  { %640 = vmatprep.subr.bf16.mxu0 %v748_v4  ;;  %v711_v61 = vld [vmem:[%s959_s4 + $0x38] sm:$0xff]   ;;  %603 = vmatprep.subr.bf16.mxu1 %v710_v60  ;;  %v713_v63 = vld [vmem:[%s959_s4 + $0x30] sm:$0xff]   ;;  %v714_v0 = vld [vmem:[%s959_s4 + $0x68] sm:$0xff]   ;;  %s547_s19 = sshll.u32 %s755_s18, 4  ;;  %s548_s19 = int_to_ptr.vmem [resolvable:$true] %s547_s19 }
  0x15   :  { %604 = vmatpush3.bf16.msra.mxu1 %v711_v61  ;;  %v715_v1 = vld [vmem:[%s959_s4 + $0x28] sm:$0xff]   ;;  %v716_v2 = vld [vmem:[%s959_s4 + $0x60] sm:$0xff]   ;;  %v719_v5 = vld [vmem:[%s959_s4 + $0x18] sm:$0xff]   ;;  %p731_p1 = scmp.lt.s32.totalorder %s548_s19, %s548_s19 }
  0x16   :  { %605 = vmatprep.subr.bf16.mxu1 %v712_v62  ;;  %v717_v3 = vld [vmem:[%s959_s4 + $0x20] sm:$0xff]   ;;  %v722_v8 = vld [vmem:[%s959_s4 + $0x48] sm:$0xff]  }
  0x17   :  { %641 = vmatpush3.bf16.msra.mxu0 %v704_v33  ;;  %v723_v9 = vld [vmem:[%s959_s4 + $0x8] sm:$0xff]   ;;  %v566_v10 = vld [vmem:[%s957_s2] ss:$0 sm:$0xff] }
  0x18   :  { %642 = vmatprep.subr.bf16.mxu0 %v748_v4  ;;  %v567_v12 = vld [vmem:[%s958_s3] ss:$0 sm:$0xff]  ;;  %s754_s3 = smov 64  }
  0x19   :  { %606 = vmatpush3.bf16.msra.mxu1 %v713_v63  ;;  %v724_v22 = vld [vmem:[%s959_s4 + $0x40] sm:$0xff]  }
  0x1a   :  { %607 = vmatprep.subr.bf16.mxu1 %v714_v0  ;;  %v725_v23 = vld [vmem:[%s959_s4] sm:$0xff]  }
  0x1b   :  { %643 = vmatpush3.bf16.msra.mxu0 %v705_v34 }
  0x1c   :  { %648 = vmatprep.subr.bf16.mxu0 %v748_v4 }
  0x1d   :  { %608 = vmatpush3.bf16.msra.mxu1 %v715_v1 }
  0x1e   :  { %609 = vmatprep.subr.bf16.mxu1 %v716_v2  ;;  %v589_v2 = vld [vmem:[%s960_s5] ss:$0 sm:$0xff]  ;;  %s726_s5 = scalar_lea.vmem %s548_s19, 128 }
  0x1f   :  { %p727_p0 = scmp.ne.s32.totalorder %s548_s19, %s726_s5  ;;  %p732_p2 = scmp.lt.s32.totalorder %s726_s5, %s726_s5 }
  0x21   :  { %610 = vmatpush3.bf16.msra.mxu1 %v717_v3  ;;  %p733_p3 = por %p732_p2, %p731_p1 }
  0x23   :  { %p734_p4 = pnand %p733_p3, %p727_p0 }
  0x7c   :  { %v671_v35 = vpop.permute.xlu0 %670 }
  0x7d   :  { %v681_v36 = vpop.permute.xlu1 %680  ;;  %v673_v37 = vunpack.i.h.bf16 %v671_v35  ;;  %v672_v38 = vunpack.i.l.bf16 %v671_v35 }
  0x7e   :  { %v683_v40 = vunpack.i.h.bf16 %v681_v36  ;;  %v682_v41 = vunpack.i.l.bf16 %v681_v36 }
  0x7f   :  { %v86_v45 = vsel %vm84_vm4, %v808_v6, %v673_v37  ;;  %v85_v46 = vsel %vm84_vm4, %v811_v7, %v672_v38  ;;  %v720_v6 = vld [vmem:[%s959_s4 + $0x50] sm:$0xff]  }
  0x80   :  { %v676_v39 = vpop.permute.xlu0 %675  ;;  %v721_v7 = vld [vmem:[%s959_s4 + $0x10] sm:$0xff]  }
  0x81   :  { %v678_v42 = vunpack.i.h.bf16 %v676_v39  ;;  %v677_v43 = vunpack.i.l.bf16 %v676_v39  ;;  %v686_v44 = vpop.permute.xlu1 %685 }
  0x82   :  { %v688_v47 = vunpack.i.h.bf16 %v686_v44  ;;  %v687_v48 = vunpack.i.l.bf16 %v686_v44 }
  0x83   :  { %v88_v49 = vsel %vm87_vm5, %v85_v46, %v677_v43  ;;  %v89_v50 = vsel %vm87_vm5, %v86_v45, %v678_v42 }
  0x84   :  { %v91_v51 = vsel %vm90_vm6, %v88_v49, %v682_v41  ;;  %v92_v52 = vsel %vm90_vm6, %v89_v50, %v683_v40 }
  0x85   :  { %v94_v53 = vsel %vm93_vm7, %v91_v51, %v687_v48  ;;  %v95_v54 = vsel %vm93_vm7, %v92_v52, %v688_v47 }
  0x86   :  { %v96_v55 = vpack.c.bf16 %v95_v54, %v94_v53 }
  0x88   :  { %645 = vmatmul.mubr.msk.bf16.vlgmr.msra.gmra.mxu0 %vm149_vm8, %v96_v55 }
  0x89   :  { %656 = vmatprep.mubr.msk.bf16.mxu0 %vm751_vm3, %v748_v4  ;;  %649 = vmatpush3.bf16.msra.mxu0 %v706_v56 }
  0x8a   :  { %650 = vmatprep.subr.bf16.mxu0 %v748_v4 }
  0x8d   :  { %651 = vmatpush3.bf16.msra.mxu0 %v707_v57 }
  0x8e   :  { %652 = vmatprep.subr.bf16.mxu0 %v748_v4 }
  0x91   :  { %653 = vmatpush3.bf16.msra.mxu0 %v708_v58 }
  0x92   :  { %654 = vmatprep.subr.bf16.mxu0 %v748_v4  ;;  %v718_v4 = vld [vmem:[%s959_s4 + $0x58] sm:$0xff]  }
  0x93   :  { %611 = vmatprep.subr.bf16.mxu1 %v718_v4 }
  0x94   :  { %612 = vmatpush3.bf16.msra.mxu1 %v719_v5  ;;  %v590_v5 = vld [vmem:[%s961_s6] ss:$0 sm:$0xff] }
  0x95   :  { %655 = vmatpush3.bf16.msra.mxu0 %v709_v59  ;;  %613 = vmatprep.subr.bf16.mxu1 %v720_v6 }
  0x98   :  { %614 = vmatpush3.bf16.msra.mxu1 %v721_v7 }
  0x99   :  { %615 = vmatprep.subr.bf16.mxu1 %v722_v8 }
  0x9c   :  { %616 = vmatpush3.bf16.msra.mxu1 %v723_v9 }
  0x9d   :  { %617 = vmatprep.subr.bf16.mxu1 %v724_v22 }
  0xa0   :  { %618 = vmatpush3.bf16.msra.mxu1 %v725_v23 }
 0x148   :  { %v190_v11 = vpop.f32.mrf.mxu0 }
 0x149   :  { %v204_v13 = vmul.f32 %v566_v10, %v190_v11 }
 0x14a   :  { %v646_v14 = vpop.f32.mrf.mxu0 }
 0x14b   :  { %v213_v15 = vadd.f32 %v567_v12, %v204_v13 }
 0x14c   :  { %v193_v16 = vpop.f32.mrf.mxu0 }
 0x14d   :  { %v215_v17 = vmax.f32 %v213_v15, 0.0  ;;  %v205_v18 = vmul.f32 %v566_v10, %v193_v16 }
 0x14e   :  { %v647_v19 = vpop.f32.mrf.mxu0 }
 0x14f   :  { %v219_v20 = vrot.slane %v215_v17, 4  ;;  %v214_v21 = vadd.f32 %v567_v12, %v205_v18 }
 0x151   :  { %v216_v24 = vmax.f32 %v214_v21, 0.0  ;;  %v225_v25 = vsel %vm32_vm0, 0.0, %v219_v20 }
 0x152   :  { %v247_v29 = vrot.slane %v225_v25, 6  ;;  %v229_v30 = vrot.slane %v225_v25, 2  ;;  %v240_v45 = vrot.slane %v225_v25, 4 }
 0x153   :  { %v220_v26 = vrot.slane %v216_v24, 4 }
 0x155   :  { %v221_v27 = vsel %vm32_vm0, %v219_v20, %v220_v26  ;;  %v226_v28 = vsel %vm32_vm0, %v220_v26, 0.0 }
 0x156   :  { %v265_v31 = vpack.c.bf16 %v226_v28, %v221_v27  ;;  %v248_v32 = vrot.slane %v221_v27, 6  ;;  %v250_v33 = vrot.slane %v226_v28, 6  ;;  %v230_v34 = vrot.slane %v221_v27, 2 }
 0x157   :  { %v232_v35 = vrot.slane %v226_v28, 2  ;;  %v241_v42 = vrot.slane %v221_v27, 4  ;;  %v243_v43 = vrot.slane %v226_v28, 4 }
 0x158   :  { %657 = vmatmul.mubr.msk.bf16.vlgmr.msra.gmra.mxu0 %vm258_vm9, %v265_v31  ;;  %v249_v36 = vsel %vm66_vm2, %v247_v29, %v248_v32  ;;  %v251_v37 = vsel %vm66_vm2, %v248_v32, %v250_v33  ;;  %v231_v38 = vsel %vm43_vm1, %v229_v30, %v230_v34 }
 0x159   :  { %v689_v39 = vpack.i.bf16 %v251_v37, %v249_v36  ;;  %v233_v40 = vsel %vm43_vm1, %v230_v34, %v232_v35  ;;  %v242_v51 = vsel %vm32_vm0, %v240_v45, %v241_v42  ;;  %v244_v52 = vsel %vm32_vm0, %v241_v42, %v243_v43 }
 0x15a   :  { %v694_v41 = vpack.i.bf16 %v233_v40, %v231_v38 }
 0x15b   :  { %690 = vrot.lane.b32.xlu0 %v689_v39, %s754_s3 }
 0x15c   :  { %695 = vrot.lane.b32.xlu1 %v694_v41, %s754_s3 }
 0x1cd   :  { %v691_v44 = vpop.permute.xlu0 %690 }
 0x1ce   :  { %v693_v46 = vunpack.i.h.bf16 %v691_v44  ;;  %v692_v47 = vunpack.i.l.bf16 %v691_v44  ;;  %v696_v48 = vpop.permute.xlu1 %695 }
 0x1cf   :  { %v698_v49 = vunpack.i.h.bf16 %v696_v48  ;;  %v697_v50 = vunpack.i.l.bf16 %v696_v48 }
 0x1d0   :  { %v261_v53 = vsel %vm258_vm9, %v242_v51, %v692_v47  ;;  %v262_v54 = vsel %vm258_vm9, %v244_v52, %v693_v46 }
 0x1d1   :  { %v264_v55 = vpack.c.bf16 %v262_v54, %v261_v53  ;;  %v259_v56 = vsel %vm258_vm9, %v225_v25, %v697_v50  ;;  %v260_v57 = vsel %vm258_vm9, %v221_v27, %v698_v49 }
 0x1d2   :  { %v263_v58 = vpack.c.bf16 %v260_v57, %v259_v56 }
 0x1d3   :  { %461 = vmatprep.mubr.bf16.mxu1 %v264_v55 }
 0x1d4   :  { %462 = vmatmul.mubr.bf16.vlgmr.msra.gmra.mxu1 %v263_v58 }
 0x218   :  { %v504_v59 = vpop.f32.mrf.mxu0 }
 0x21a   :  { %v658_v60 = vpop.f32.mrf.mxu0 }
 0x21c   :  { %v507_v61 = vpop.f32.mrf.mxu0 }
 0x21e   :  { %v659_v62 = vpop.f32.mrf.mxu0 }
 0x294   :  { %v619_v63 = vpop.f32.mrf.mxu1 }
 0x296   :  { %v620_v0 = vpop.f32.mrf.mxu1 }
 0x297   :  { %v621_v1 = vadd.f32 %v620_v0, %v619_v63 }
 0x298   :  { %v622_v3 = vpop.f32.mrf.mxu1 }
 0x299   :  { %v505_v4 = vadd.f32 %v621_v1, %v504_v59 }
 0x29a   :  { %v623_v6 = vpop.f32.mrf.mxu1 }
 0x29b   :  { %v518_v7 = vmul.f32 %v589_v2, %v505_v4  ;;  %v624_v8 = vadd.f32 %v623_v6, %v622_v3 }
 0x29d   :  { %v527_v9 = vadd.f32 %v590_v5, %v518_v7  ;;  %v508_v10 = vadd.f32 %v624_v8, %v507_v61 }
 0x29f   :  { %v529_v11 = vmax.f32 %v527_v9, 0.0  ;;  %v519_v12 = vmul.f32 %v589_v2, %v508_v10 }
 0x2a1   :  { %v593_v13 = vpack.c.bf16 %v529_v11, %v529_v11  ;;  %v528_v14 = vadd.f32 %v590_v5, %v519_v12 }
 0x2a3   :  { %v530_v15 = vmax.f32 %v528_v14, 0.0  ;;  %540 = vst.msk [vmem:[#allocation2] sm:$0xf] %vm539_vm10, %v593_v13 }
 0x2a5   :  { %v594_v16 = vpack.c.bf16 %v530_v15, %v530_v15 }
 0x2a7   :  { %541 = vst.msk [vmem:[#allocation2 + $0x4] sm:$0xf] %vm539_vm10, %v594_v16 }
 0x2a8   :  { %737 = shalt.err (!%p734_p4)
}
 0x2a9   :  { %s756_s6 = smov 4  }
 0x2aa   :  { %553 = dma.vmem_to_hbm [thread:$0]  %s548_s19, 128, %s962_s7, [#allocation3], %s754_s3, %s754_s3, %s756_s6  }
 0x2ab   :  { %746 = dma.done.wait [#allocation3], 128  }
 0x2ac   :  { %747 = vsyncadd [#allocation3], 4294967168 }
 0x2ad   :  { %557 = vsyncpa [#allocation3], 1 }

</bundles_post_ra>
